<compile_context>
chip_gen: v7x
topology: tpu7x:2x2x1
jax: 0.10.0
libtpu: 0.0.40
codegen_flags: <defaults>
</compile_context>

<pallas_src>
import jax
import jax.numpy as jnp
from jax.experimental import pallas as pl
from jax.experimental.pallas import tpu as pltpu

_MAX_SAMPLES_PER_BLOCK = 16  # caps the static unroll in the kernel


def _drop_path_kernel(scale_ref, x_ref, o_ref):
    # scale_ref: (B,) fp32 per-sample scales in SMEM (scalar-prefetched)
    # x_ref/o_ref: (K, TILE_N, D) VMEM block for sample-group g, token-tile t
    g = pl.program_id(0)
    k = x_ref.shape[0]                       # samples per block (static)
    base = g * k
    for i in range(k):                       # static & small -> unrolled at trace time
        s = scale_ref[base + i]              # fp32 scalar: 0.0 or 1/keep_prob
        o_ref[i, :, :] = (x_ref[i, :, :] * s).astype(o_ref.dtype)


def _sublane_granularity(itemsize: int) -> int:
    # 8 rows for 4-byte dtypes, 16 for 2-byte, 32 for 1-byte (sublane packing).
    return max(8, 32 // max(itemsize, 1))


def _round_up(v: int, m: int) -> int:
    return ((v + m - 1) // m) * m


def _chip_tuning():
    """(target block bytes, base scoped-VMEM limit bytes) per TPU generation."""
    kind = ""
    try:
        kind = jax.devices()[0].device_kind.lower()
    except Exception:
        pass
    if "v5" in kind:
        return 2 << 20, 16 << 20          # v5e: small scoped-VMEM default, slower HBM
    if "v7" in kind or "7x" in kind:
        return 8 << 20, 48 << 20          # v7x: fast HBM, 64 MiB physical VMEM
    return 4 << 20, 32 << 20              # v6e / unknown


def _pick_tiling(B: int, N: int, D: int, itemsize: int, target_bytes: int):
    """Return (samples_per_block K, token tile TILE_N)."""
    gran = _sublane_granularity(itemsize)
    row_bytes = D * itemsize
    sample_bytes = N * row_bytes

    if sample_bytes > target_bytes:
        # Large samples: one sample per block, tile along tokens.
        tile_n = max(gran, (target_bytes // row_bytes) // gran * gran)
        return 1, min(tile_n, N)

    # Small samples: pack K whole samples per block (K divides B).
    max_k = int(max(1, min(target_bytes // max(sample_bytes, 1),
                           _MAX_SAMPLES_PER_BLOCK)))
    k = 1
    for cand in range(min(B, max_k), 0, -1):
        if B % cand == 0:
            k = cand
            break
    # Keep at least 2 grid steps so both v7x TensorCores get work.
    if B // k < 2 and B >= 2:
        for cand in range(k - 1, 0, -1):
            if B % cand == 0 and B // cand >= 2:
                k = cand
                break
    tile_n = N
    if (B // k) < 2 and N > gran:
        # B == 1: split the token axis instead so the grid has >= 2 steps.
        tile_n = min(N, max(gran, _round_up((N + 1) // 2, gran)))
    return k, tile_n


def drop_path_pallas(x: jax.Array, drop_prob: float, training: bool, key,
                     tile_n: int | None = None,
                     samples_per_block: int | None = None) -> jax.Array:
    """Pallas implementation of VJEPA2DropPath.forward on (B, N, D) hidden states.

    Note: drop_prob / training must be static Python values (torch-style
    early return); tracing them under jit would raise.
    """
    if drop_prob == 0.0 or not training:
        return x                                     # torch early-return path

    assert x.ndim == 3, "kernel assumes (B, N, D) hidden states"
    B, N, D = x.shape
    keep_prob = 1.0 - drop_prob

    # Per-sample random mask, same recipe as torch: floor(keep_prob + U[0,1)).
    # Tiny (B,) glue in plain JAX; the elementwise hot path runs in Pallas.
    u = jax.random.uniform(key, (B,), dtype=jnp.float32)
    mask = jnp.floor(keep_prob + u)                  # 0.0 or 1.0 per sample
    scale = mask / jnp.float32(keep_prob)            # fp32 (no bf16 pre-quantization)

    itemsize = jnp.dtype(x.dtype).itemsize
    gran = _sublane_granularity(itemsize)
    target_bytes, base_vmem_limit = _chip_tuning()

    auto_k, auto_tile = _pick_tiling(B, N, D, itemsize, target_bytes)
    k = samples_per_block if samples_per_block is not None else (
        1 if tile_n is not None else auto_k)
    tn = tile_n if tile_n is not None else auto_tile

    if B % k != 0:
        raise ValueError(f"samples_per_block={k} must divide batch={B}")
    if tn != N and tn % gran != 0:
        raise ValueError(f"tile_n={tn} must equal N={N} or be a multiple of "
                         f"{gran} (sublane granularity for {x.dtype})")

    grid = (B // k, (N + tn - 1) // tn)              # ragged last token tile is masked
    block_bytes = k * tn * D * itemsize
    # Double-buffered in+out is ~4x block; leave a little headroom on top.
    vmem_limit = int(max(base_vmem_limit, 4 * block_bytes + (2 << 20)))

    return pl.pallas_call(
        _drop_path_kernel,
        out_shape=jax.ShapeDtypeStruct((B, N, D), x.dtype),
        grid_spec=pltpu.PrefetchScalarGridSpec(
            num_scalar_prefetch=1,                   # scale -> SMEM, first kernel arg
            grid=grid,
            in_specs=[
                pl.BlockSpec((k, tn, D), lambda g, t, scale_ref: (g, t, 0)),
            ],
            out_specs=pl.BlockSpec((k, tn, D), lambda g, t, scale_ref: (g, t, 0)),
        ),
        compiler_params=pltpu.CompilerParams(
            dimension_semantics=("parallel", "parallel"),
            vmem_limit_bytes=vmem_limit,
        ),
        cost_estimate=pl.CostEstimate(
            flops=B * N * D,
            transcendentals=0,
            bytes_accessed=2 * B * N * D * itemsize,
        ),
        input_output_aliases={1: 0},                 # x (arg 1, after scale) -> out 0
    )(scale, x)


def drop_path_reference(x, drop_prob, training, key):
    """Pure-JAX mirror of the torch semantics (div then mul)."""
    if drop_prob == 0.0 or not training:
        return x
    keep_prob = 1.0 - drop_prob
    u = jax.random.uniform(key, (x.shape[0],), dtype=jnp.float32)
    mask = jnp.floor(keep_prob + u).astype(x.dtype).reshape(
        (x.shape[0],) + (1,) * (x.ndim - 1))
    return x / keep_prob * mask


if __name__ == "__main__":
    drop_prob = 0.25
    root = jax.random.PRNGKey(0)
    k_x, k_mask, k_x2, k_x3, k_x4, k_x5 = jax.random.split(root, 6)

    # 1) Basic VJEPA2-style hidden states (batch, seq, hidden); D=128 keeps the
    #    output tile lane-dense even at demo size.
    x = jax.random.normal(k_x, (2, 8, 128), dtype=jnp.float32)
    y = jax.block_until_ready(drop_path_pallas(x, drop_prob, training=True, key=k_mask))
    y_ref = drop_path_reference(x, drop_prob, training=True, key=k_mask)
    assert y.shape == x.shape and y.dtype == x.dtype
    assert jnp.allclose(y, y_ref, atol=1e-6, rtol=1e-5)

    # 2) Tiled / ragged token grid (manual tile_n, N not a multiple of tile_n).
    x2 = jax.random.normal(k_x2, (2, 24, 128), dtype=jnp.float32)
    y2 = jax.block_until_ready(
        drop_path_pallas(x2, drop_prob, training=True, key=k_mask, tile_n=16))
    assert jnp.allclose(y2, drop_path_reference(x2, drop_prob, True, k_mask),
                        atol=1e-6, rtol=1e-5)

    # 3) Small-sample packing path: auto tiling packs K=2 samples per block.
    x3 = jax.random.normal(k_x3, (4, 8, 128), dtype=jnp.float32)
    y3 = jax.block_until_ready(drop_path_pallas(x3, drop_prob, training=True, key=k_mask))
    assert jnp.allclose(y3, drop_path_reference(x3, drop_prob, True, k_mask),
                        atol=1e-6, rtol=1e-5)

    # 4) B == 1: token axis auto-split so the grid keeps >= 2 steps (v7x 2-TC).
    x4 = jax.random.normal(k_x4, (1, 32, 128), dtype=jnp.float32)
    y4 = jax.block_until_ready(drop_path_pallas(x4, drop_prob, training=True, key=k_mask))
    assert jnp.allclose(y4, drop_path_reference(x4, drop_prob, True, k_mask),
                        atol=1e-6, rtol=1e-5)

    # 5) bf16 activations (fp32 scale mul, cast on store; <= 1 bf16 ulp vs torch).
    x5 = jax.random.normal(k_x5, (2, 32, 128), dtype=jnp.float32).astype(jnp.bfloat16)
    y5 = jax.block_until_ready(drop_path_pallas(x5, drop_prob, training=True, key=k_mask))
    y5_ref = drop_path_reference(x5, drop_prob, True, k_mask)
    assert y5.dtype == jnp.bfloat16
    assert jnp.allclose(y5.astype(jnp.float32), y5_ref.astype(jnp.float32),
                        atol=2e-2, rtol=2e-2)

    # Eval / drop_prob=0 paths are identity (matches torch early return).
    assert jnp.array_equal(drop_path_pallas(x, drop_prob, training=False, key=k_mask), x)
    assert jnp.array_equal(drop_path_pallas(x, 0.0, training=True, key=k_mask), x)

    print("KERNEL_OK")
</pallas_src>

<mosaic_0001>
module attributes {stable_mosaic.version = 11 : i64} {
  func.func @_drop_path_kernel(%arg0: i32, %arg1: i32, %arg2: memref<2xf32, #tpu.memory_space<smem>>, %arg3: memref<1x8x128xf32, #tpu.memory_space<vmem>>, %arg4: memref<1x8x128xf32, #tpu.memory_space<vmem>>) attributes {dimension_semantics = [#tpu.dimension_semantics<parallel>, #tpu.dimension_semantics<parallel>], iteration_bounds = array<i64: 2, 1>, scalar_prefetch = 1 : i64, scratch_operands = 0 : i64, tpu.core_type = #tpu.core_type<tc>, window_params = [{transform_indices = @transform_0, window_bounds = array<i64: 1, 8, 128>}, {transform_indices = @transform_1, window_bounds = array<i64: 1, 8, 128>}]} {
    %c1_i32 = arith.constant 1 : i32
    %0 = arith.muli %arg0, %c1_i32 : i32
    %c0_i32 = arith.constant 0 : i32
    %1 = arith.addi %0, %c0_i32 : i32
    %2 = arith.index_cast %1 : i32 to index
    %3 = memref.load %arg2[%2] : memref<2xf32, #tpu.memory_space<smem>>
    %c0 = arith.constant 0 : index
    %c0_0 = arith.constant 0 : index
    %c0_1 = arith.constant 0 : index
    %4 = vector.load %arg3[%c0, %c0_0, %c0_1] : memref<1x8x128xf32, #tpu.memory_space<vmem>>, vector<1x8x128xf32>
    %5 = vector.shape_cast %4 : vector<1x8x128xf32> to vector<8x128xf32>
    %6 = vector.broadcast %3 : f32 to vector<8x128xf32>
    %7 = arith.mulf %5, %6 : vector<8x128xf32>
    %c0_2 = arith.constant 0 : index
    %c0_3 = arith.constant 0 : index
    %c0_4 = arith.constant 0 : index
    %8 = vector.load %arg4[%c0_2, %c0_3, %c0_4] : memref<1x8x128xf32, #tpu.memory_space<vmem>>, vector<1x8x128xf32>
    %9 = vector.shape_cast %8 : vector<1x8x128xf32> to vector<8x128xf32>
    %10 = vector.shape_cast %7 : vector<8x128xf32> to vector<1x8x128xf32>
    tpu.vector_store %arg4[%c0_2, %c0_3, %c0_4], %10 {strides = array<i32>} : memref<1x8x128xf32, #tpu.memory_space<vmem>>, vector<1x8x128xf32>,
    return
  }
  func.func @transform_0(%arg0: i32, %arg1: i32, %arg2: memref<2xf32, #tpu.memory_space<smem>>) -> (i32, i32, i32) {
    %c0_i32 = arith.constant 0 : i32
    %c0_i32_0 = arith.constant 0 : i32
    return %arg0, %arg1, %c0_i32 : i32, i32, i32
  }
  func.func @transform_1(%arg0: i32, %arg1: i32, %arg2: memref<2xf32, #tpu.memory_space<smem>>) -> (i32, i32, i32) {
    %c0_i32 = arith.constant 0 : i32
    %c0_i32_0 = arith.constant 0 : i32
    return %arg0, %arg1, %c0_i32 : i32, i32, i32
  }
}

</mosaic_0001>

<bundles_post_ra>
// kernel: tpu_custom_call.1
= control target key start
LH: loop header
LB: loop body
LE: loop exit
PB: predicated region body
PF: predicated region fallthrough
CT: control target
= control target key end

     0   :  { %s654_s0 = inlined_call_operand.vmem [shape: f32[2], index: 0, kind: input, shape index: {}]   ;;  %s655_s1 = inlined_call_operand.hbm [shape: f32[2,8,128], index: 1, kind: input, shape index: {}, may-alias: {1,2}]   ;;  %s656_s2 = inlined_call_operand.hbm [shape: f32[2,8,128], index: 2, kind: output, shape index: {}, may-alias: {1,2}]  }
   0x1   :  { %s7_s11 = sshll.u32 %s654_s0, 4  ;;  %s8_s11 = int_to_ptr.vmem [resolvable:$true] %s7_s11 }
   0x2   :  { %s332_s12 = scalar_lea.vmem %s8_s11, 16  ;;  %p337_p1 = scmp.lt.s32.totalorder %s8_s11, %s8_s11 }
   0x3   :  { %p333_p0 = scmp.ne.s32.totalorder %s8_s11, %s332_s12  ;;  %p338_p2 = scmp.lt.s32.totalorder %s332_s12, %s332_s12 }
   0x5   :  { %p339_p3 = por %p338_p2, %p337_p1 }
   0x7   :  { %p340_p4 = pnand %p339_p3, %p333_p0 }
   0x9   :  { %343 = shalt.err (!%p340_p4)  }
   0xa   :  { %s460_s13 = smov [#allocation3]  }
   0xb   :  { %10 = dma.vmem_to_smem %s8_s11, 16, %s460_s13, [#allocation2] }
   0xc   :  { %426 = dma.done.wait [#allocation2], 16 }
   0xd   :  { %427 = vsyncadd [#allocation2], 4294967280 }
   0xe   :  { %12 = sfence }
   0xf   :  { %13 = vsyncpa [#allocation5], 0 }
  0x10   :  { %15 = vsyncpa [#allocation5 + $0x1], 0 }
  0x11   :  { %16 = vsyncpa [#allocation6], 0 }
  0x12   :  { %18 = vsyncpa [#allocation6 + $0x1], 0  ;;  %s481_s14 = smov 0   ;;  %s483_s0 = smov 0  }
  0x13   :  { %s485_s15 = smov 0   ;;  %s487_s16 = smov 0  }
  0x14   :  { %s489_s17 = smov 0   ;;  %s491_s18 = smov 0  }
  0x15 LB: > { %s256_s19 = sadd.s32 4294967295, %s458_s18   ;;  %s257_s20 = sadd.s32 4294967294, %s458_s18   ;;  %s458_s18 = sphi %s491_s18, %s24_s18   ;;  %s454_s17 = sphi %s489_s17, %s672_s17   ;;  %s450_s16 = sphi %s487_s16, %s671_s16   ;;  %s446_s15 = sphi %s485_s15, %s670_s15   ;;  %s442_s0 = sphi %s483_s0, %s669_s0   ;;  %s438_s14 = sphi %s481_s14, %s668_s14  }
  0x16   : > { %s36_s21 = sadd.s32 1, %s454_s17  ;;  %s45_s22 = sadd.s32 1, %s446_s15 }
  0x17   : > { %p38_p5 = scmp.ge.s32.totalorder %s36_s21, 2  ;;  %p52_p6 = scmp.ne.s32.totalorder %s446_s15, %s442_s0 }
  0x18   : > { %p53_p7 = scmp.eq.s32.totalorder %s458_s18, 0  ;;  %p58_p8 = scmp.ne.s32.totalorder %s442_s0, %s438_s14 }
  0x19   : > { %s674_s21 = smov (%p38_p5, %s36_s21), 0  ;;  %p59_p10 = scmp.eq.s32.totalorder %s256_s19, 0 }
  0x1a   : > { %p522_p9 = por %p53_p7, %p52_p6  ;;  %s40_s24 = ssub.s32 %s454_s17, %s674_s21 }
  0x1b   : > { %p84_p11 = scmp.eq.s32.totalorder %s256_s19, 1  ;;  %p43_p12 = scmp.eq.s32.totalorder %s40_s24, 0 }
  0x1c   : > { %p528_p13 = por %p59_p10, %p58_p8  ;;  %p90_p1 = scmp.eq.s32.totalorder %s257_s20, 1 }
  0x1d   : > { %p532_p0 = por %p84_p11, %p52_p6  ;;  %p281_p4 = scmp.lt.s32.totalorder %s458_s18, 2 }
  0x1e   : > { %s537_s27 = scalar_select %p43_p12, %s446_s15, %s45_s22  }
  0x1f   : > { %s660_s26 = scalar_select %p532_p0, 1, 0 }
  0x20   : > { %p539_p2 = por %p90_p1, %p58_p8  ;;  %s110_s29 = sand.u32 1, %s446_s15  }
  0x21   : > { %s260_s30 = sshll.u32 %s110_s29, 3  ;;  %s261_s3 = sshll.u32 %s454_s17, 7 }
  0x22   : > { %s661_s28 = scalar_select %p539_p2, 1, 0 }
  0x23   : > { %s550_s6 = scalar_lea.hbm %s655_s1, %s261_s3  ;;  %s114_s7 = scalar_lea.vmem [#allocation4], %s260_s30 }
  0x24   : > { %s122_s8 = sshll.u32 %s114_s7, 4  ;;  %p556_p5 = pnand %p281_p4, %p522_p9  ;;  %s552_s8 = int_to_ptr.vmem [resolvable:$true] %s122_s8 }
  0x25   : > { %s111_s10 = scalar_lea.sflag [#allocation5], %s110_s29  ;;  %s344_s11 = scalar_lea.hbm %s550_s6, 128 }
  0x26   : > { %p345_p8 = scmp.ne.s32.totalorder %s550_s6, %s344_s11  ;;  %p346_p10 = pneg %p556_p5 }
  0x27   : > { %s349_s19 = scalar_lea.hbm %s655_s1, 256  ;;  %p350_p9 = scmp.lt.u32.totalorder %s550_s6, %s655_s1 }
  0x28   : > { %p347_p11 = pnand %p346_p10, %p345_p8  ;;  %p351_p1 = scmp.lt.u32.totalorder %s349_s19, %s344_s11 }
  0x29   : > { %p353_p3 = scmp.lt.u32.totalorder %s344_s11, %s550_s6 }
  0x2a   : > { %p348_p12 = pneg %p347_p11  ;;  %p352_p4 = por %p351_p1, %p350_p9 }
  0x2c   : > { %p354_p6 = por %p353_p3, %p352_p4 }
  0x2e   : > { %p355_p7 = pnand %p354_p6, %p348_p12 }
  0x30   : > { %358 = shalt.err (!%p355_p7)
}
  0x31   : > { %s359_s23 = scalar_lea.vmem %s552_s8, 128  ;;  %s461_s24 = smov [#allocation4]  }
  0x32   : > { %p360_p8 = scmp.ne.s32.totalorder %s552_s8, %s359_s23  ;;  %s364_s29 = sshll.u32 %s461_s24, 4  ;;  %s365_s29 = int_to_ptr.vmem [resolvable:$false] %s364_s29 }
  0x33   : > { %s366_s30 = scalar_lea.vmem %s365_s29, 256  ;;  %p367_p0 = scmp.lt.s32.totalorder %s552_s8, %s365_s29 }
  0x34   : > { %p362_p11 = pnand %p360_p8, %p346_p10  ;;  %p368_p9 = scmp.lt.s32.totalorder %s366_s30, %s359_s23 }
  0x36   : > { %p363_p2 = pneg %p362_p11  ;;  %p369_p1 = por %p368_p9, %p367_p0 }
  0x38   : > { %p370_p3 = pnand %p369_p1, %p363_p2 }
  0x3a   : > { %373 = shalt.err (!%p370_p3)
}
  0x3b   : > { %276 = dma.hbm_to_vmem [thread:$0]  (!%p556_p5), %s550_s6, 128, %s552_s8, %s111_s10  }
  0x3c   : > { %p663_p6 = scmp.lt.s32.totalorder %s458_s18, 3  ;;  %p664_p7 = scmp.ge.s32.totalorder %s458_s18, 1 }
  0x3e   : > { %p128_p10 = pnand %p664_p7, %p663_p6 }
  0x3f   : > { %s592_s3 = sand.u32 (!%p128_p10), 1, %s442_s0  }
  0x40   : > { %131 = sbr.rel (%p128_p10) target bundleno = 98 (0x62), region = 24  ;;  %s263_s4 = sshll.u32 (!%p128_p10), %s592_s3, 3 }
  0x41   : > { %s134_s5 = scalar_lea.sflag (!%p128_p10), [#allocation5], %s592_s3  ;;  %s137_s7 = scalar_lea.vmem (!%p128_p10), [#allocation4], %s263_s4 }
  0x47   : > { %429 = dma.done.wait (%p528_p13), %s134_s5, 128  }
  0x48   : > { %431 = vsyncadd (%p528_p13), %s134_s5, 4294967168  ;;  %s156_s6 = sld [smem:[#allocation3 + %s450_s16]]  ;;  %s155_s8 = scalar_lea.vmem [#allocation7], %s263_s4  ;;  %v157_v0 = vld [vmem:[%s137_s7] sm:$0xff] }
  0x49   : > { %s176_s9 = sshll.u32 %s155_s8, 4  ;;  %s266_s10 = sshll.u32 %s450_s16, 7  ;;  %s602_s9 = int_to_ptr.vmem [resolvable:$true] %s176_s9 }
  0x4a   : > { %s607_s25 = scalar_lea.hbm %s656_s2, %s266_s10  ;;  %s162_s13 = scalar_lea.sflag [#allocation6], %s592_s3 }
  0x4b   : > { %s374_s19 = scalar_lea.vmem %s602_s9, 128  ;;  %p665_p0 = scmp.ne.s32.totalorder %s660_s26, 0 }
  0x4c   : > { %p375_p13 = scmp.ne.s32.totalorder %s602_s9, %s374_s19  ;;  %s462_s16 = smov [#allocation7]  }
  0x4d   : > { %s378_s20 = sshll.u32 %s462_s16, 4  ;;  %s379_s20 = int_to_ptr.vmem [resolvable:$false] %s378_s20 }
  0x4e   : > { %v158_v1 = vstv %s156_s6  ;;  %p376_p2 = pnand %p375_p13, %p665_p0  ;;  %s380_s22 = scalar_lea.vmem %s379_s20, 256 }
  0x4f   : > { %v159_v2 = vmul.f32 %v158_v1, %v157_v0  ;;  %p381_p12 = scmp.lt.s32.totalorder %s602_s9, %s379_s20  ;;  %p382_p4 = scmp.lt.s32.totalorder %s380_s22, %s374_s19 }
  0x50   : > { %p377_p5 = pneg %p376_p2 }
  0x51   : > { %160 = vst [vmem:[%s155_s8] sm:$0xff] %v159_v2  ;;  %p383_p8 = por %p382_p4, %p381_p12 }
  0x53   : > { %p384_p11 = pnand %p383_p8, %p377_p5 }
  0x55   : > { %387 = shalt.err (!%p384_p11)
}
  0x56   : > { %s388_s23 = scalar_lea.hbm %s607_s25, 128  ;;  %s392_s30 = scalar_lea.hbm %s656_s2, 256 }
  0x57   : > { %p389_p9 = scmp.ne.s32.totalorder %s607_s25, %s388_s23  ;;  %p393_p6 = scmp.lt.u32.totalorder %s607_s25, %s656_s2 }
  0x58   : > { %p394_p7 = scmp.lt.u32.totalorder %s392_s30, %s388_s23  ;;  %p396_p13 = scmp.lt.u32.totalorder %s388_s23, %s607_s25 }
  0x59   : > { %p390_p1 = pnand %p389_p9, %p665_p0 }
  0x5a   : > { %p395_p10 = por %p394_p7, %p393_p6 }
  0x5b   : > { %p391_p3 = pneg %p390_p1 }
  0x5c   : > { %p397_p2 = por %p396_p13, %p395_p10 }
  0x5e   : > { %p398_p5 = pnand %p397_p2, %p391_p3 }
  0x60   : > { %401 = shalt.err (!%p398_p5)
}
  0x61   : > { %271 = dma.vmem_to_hbm [thread:$0]  (%p665_p0), %s602_s9, 128, %s607_s25, %s162_s13  }
  0x62 PF: > { %s188_s5 = sand.u32 1, %s438_s14   ;;  %p666_p12 = scmp.ne.s32.totalorder %s661_s28, 0 }
  0x63   : > { %p667_p4 = scmp.ge.s32.totalorder %s458_s18, 2  ;;  %s189_s7 = scalar_lea.sflag [#allocation6], %s188_s5 }
  0x65   : > { %p278_p8 = pnand %p667_p4, %p666_p12 }
  0x67   : > { %433 = dma.done.wait (!%p278_p8), %s189_s7, 128  }
  0x68   : > { %435 = vsyncadd (!%p278_p8), %s189_s7, 4294967168  ;;  %s24_s18 = sadd.s32 1, %s458_s18   ;;  %s668_s14 = smov %s442_s0 }
  0x69   : > { %p21_p11 = scmp.ge.s32.totalorder %s24_s18, 4   ;;  %s669_s0 = smov %s446_s15 }
  0x6a   : > { %s670_s15 = smov %s537_s27  ;;  %s671_s16 = smov %s454_s17 }
  0x6b   : > { %s672_s17 = smov %s674_s21  ;;  %23 = sbr.rel (!%p21_p11) target bundleno = 21 (0x15), region = 69 }
  0x72   :  { %194 = vsyncpa [#allocation5], 1 }
  0x73   :  { %196 = vsyncpa [#allocation5 + $0x1], 1 }
  0x74   :  { %197 = vsyncpa [#allocation6], 1 }
  0x75   :  { %199 = vsyncpa [#allocation6 + $0x1], 1 }

</bundles_post_ra>
